<compile_context>
chip_gen: v5e
topology: v5e:2x2
jax: 0.10.0
libtpu: 0.0.40
codegen_flags: <defaults>
</compile_context>

<pallas_src>
import functools
import math

import jax
import jax.numpy as jnp
from jax import lax
from jax.experimental import pallas as pl
from jax.experimental.pallas import tpu as pltpu

LN_EPS = 1e-5                      # torch.nn.LayerNorm default
_LANE = 128
_SUBLANE = 8
_SQRT_2_OVER_PI = math.sqrt(2.0 / math.pi)


def _round_up(v, m):
    return ((v + m - 1) // m) * m


def _cdiv(a, b):
    return (a + b - 1) // b


def _gelu_tanh(x):
    # tanh-approximate GELU (EUP path).  Mirrored exactly in the reference.
    return 0.5 * x * (1.0 + jnp.tanh(_SQRT_2_OVER_PI * (x + 0.044715 * x * x * x)))


# ----------------------------- hardware queries ------------------------------

def _device_kind():
    try:
        return jax.devices()[0].device_kind.lower()
    except Exception:
        return ""


def _vmem_capacity_bytes():
    get_info = getattr(pltpu, "get_tpu_info", None)
    if get_info is not None:
        try:
            info = get_info()
            for attr in ("vmem_capacity_bytes", "vmem_size_bytes", "vmem_bytes"):
                v = getattr(info, attr, None)
                if v:
                    return int(v)
        except Exception:
            pass
    kind = _device_kind()
    if "v7" in kind or "7x" in kind:
        return 64 * 1024 * 1024
    return 128 * 1024 * 1024


def _vmem_budget_bytes():
    # Leave ~14 MiB (and >=20% of physical) headroom for Mosaic internal
    # scratch, semaphores, and spills.
    cap = _vmem_capacity_bytes()
    return max(min(cap - 14 * 1024 * 1024, int(cap * 0.80)), 16 * 1024 * 1024)


def _num_tensorcores():
    get_info = getattr(pltpu, "get_tpu_info", None)
    if get_info is not None:
        try:
            info = get_info()
            for attr in ("num_cores", "core_count", "num_tensor_cores", "num_tensorcores"):
                v = getattr(info, attr, None)
                if v:
                    return int(v)
        except Exception:
            pass
    kind = _device_kind()
    if "v7" in kind or "7x" in kind:
        return 2
    if "v4" in kind and "lite" not in kind:
        return 2
    if "v5p" in kind:
        return 2
    return 1


# --------------------------------- kernel ------------------------------------

def cswin_fused_kernel(x_ref, g1_ref, be1_ref, g2_ref, be2_ref,
                       w1_ref, b1_ref, w2_ref, b2_ref, o_ref, acc_ref,
                       *, true_c, resident, n_chunks, hidden_chunk):
    """All `depth` (attn-block, ffn-block) pairs for one row tile.

    Grid = (row_tiles, depth); the layer axis is the inner "arbitrary" axis and
    the activation is carried across it in `acc_ref` (VMEM).

    Block 1: Residual(PreNormDrop(SelfAttention)) -> y = x + LayerNorm(x)
             (SelfAttention returns its input; Dropout == identity in eval)
    Block 2: Residual(PreNorm(FeedForward))       -> out = y + W2 GELU(W1 LN(y)+b1)+b2
    """
    l = pl.program_id(1)
    last = pl.num_programs(1) - 1

    @pl.when(l == 0)
    def _():
        acc_ref[...] = x_ref[...].astype(jnp.float32)

    x = acc_ref[...]                                     # (TR, Cp) f32
    inv_c = 1.0 / float(true_c)

    def vec(ref):
        # resident: full (depth, 1, D) stack -> slice layer l;
        # streaming: depth axis squeezed away by the BlockSpec.
        return ref[l] if resident else ref[...]

    g1, be1 = vec(g1_ref), vec(be1_ref)
    g2, be2 = vec(g2_ref), vec(be2_ref)
    b1, b2 = vec(b1_ref), vec(b2_ref)

    def layernorm(v, gamma, beta):
        # Padded channels of `v` are exactly zero, so the sums over the padded
        # lane width already equal the sums over the true channels; use the
        # E[x^2] - mu^2 form so no padding mask multiply is needed.  Padded
        # output channels stay zero because gamma/beta pads are zero.
        mu = jnp.sum(v, axis=-1, keepdims=True) * inv_c
        ex2 = jnp.sum(v * v, axis=-1, keepdims=True) * inv_c
        var = ex2 - mu * mu
        return (v - mu) * lax.rsqrt(var + LN_EPS) * gamma + beta

    # --- attention block (dead attention compute elided, see header) ---------
    y = x + layernorm(x, g1, be1)

    # --- feed-forward block (bf16 MXU operands, f32 accumulation) ------------
    z = layernorm(y, g2, be2).astype(jnp.bfloat16)

    if n_chunks == 1:
        w1 = w1_ref[l] if resident else w1_ref[...]
        w2 = w2_ref[l] if resident else w2_ref[...]
        h = _gelu_tanh(jnp.dot(z, w1, preferred_element_type=jnp.float32) + b1
                       ).astype(jnp.bfloat16)
        f = jnp.dot(h, w2, preferred_element_type=jnp.float32)
    else:
        # Hidden-dim chunking: bounds the f32 GELU intermediate to
        # (TR, hidden_chunk) instead of (TR, Hp) for large mlp_dim.
        w1v = w1_ref.at[l] if resident else w1_ref
        w2v = w2_ref.at[l] if resident else w2_ref
        f = None
        for ci in range(n_chunks):
            c0 = ci * hidden_chunk
            hcol = jnp.dot(z, w1v[:, c0:c0 + hidden_chunk],
                           preferred_element_type=jnp.float32)
            hcol = _gelu_tanh(hcol + b1[:, c0:c0 + hidden_chunk]).astype(jnp.bfloat16)
            part = jnp.dot(hcol, w2v[c0:c0 + hidden_chunk, :],
                           preferred_element_type=jnp.float32)
            f = part if f is None else f + part

    out = y + f + b2

    @pl.when(l < last)
    def _():
        acc_ref[...] = out            # carry to next layer (skip the redundant
                                      # final-layer scratch store)

    @pl.when(l == last)
    def _():
        o_ref[...] = out.astype(o_ref.dtype)


# --------------------------------- wrapper -----------------------------------

def _pad_to(a, shape):
    out = jnp.zeros(shape, a.dtype)
    return out.at[tuple(slice(0, s) for s in a.shape)].set(a)


def _pick_hidden_chunk(hp, max_chunk):
    hc = max(_LANE, min(hp, (max_chunk // _LANE) * _LANE))
    while hp % hc != 0:
        hc -= _LANE
    return hc


def _act_vmem_bytes(tr, cp, hc):
    io = 4 * tr * cp * 4                           # x + out blocks, double-buffered f32
    scratch = tr * cp * 4                          # f32 activation carry
    temps = tr * (3 * cp * 4 + cp * 2 + hc * 6)    # y/f/out f32, z bf16, h f32+bf16
    return io + scratch + temps


def cswin_transformer_forward(x, params, *, tile_rows=None):
    """x: (B, N, C) float32; params: stacked per-layer dict from init_params."""
    B, N, C = x.shape
    depth, _, H = params["w1"].shape
    R = B * N

    Cp = _round_up(C, _LANE)       # lane-dense channels
    Hp = _round_up(H, _LANE)       # lane-dense hidden dim

    budget = _vmem_budget_bytes()  # generation-aware (v5e/v6e ~100 MiB, v7x ~50 MiB)

    # Weight residency: keep ALL layers' bf16 weights in VMEM when they fit.
    # Constant index_map -> Pallas fetches them from HBM exactly once per
    # kernel (no re-DMA per row tile).  Otherwise stream one layer per step.
    w_stack = depth * 2 * (Cp * Hp) * 2                   # w1 + w2, bf16
    vec_stack = depth * (4 * Cp + Hp + Cp) * 4            # LN params + biases, f32
    resident = 2 * (w_stack + vec_stack) <= budget // 2   # x2: double-buffered alloc
    weight_vmem = (2 * (w_stack + vec_stack) if resident
                   else 2 * (2 * Cp * Hp * 2 + (4 * Cp + Hp + Cp) * 4))
    act_budget = max(budget - weight_vmem, 4 * 1024 * 1024)

    # Hidden-dim chunk (multiple of 128 dividing Hp) and balanced row tile.
    hc = _pick_hidden_chunk(Hp, 2048)
    Rp_min = _round_up(R, _SUBLANE)
    tr_cap = max(_SUBLANE, _round_up(min(int(tile_rows) if tile_rows else 2048, Rp_min),
                                     _SUBLANE))
    tr = _round_up(_cdiv(R, _cdiv(Rp_min, tr_cap)), _SUBLANE)   # balanced, 8-aligned
    tr_floor = min(256, tr)

    # Shrink the row tile toward 256 first ...
    while _act_vmem_bytes(tr, Cp, hc) > act_budget and tr > tr_floor:
        tr = max(tr_floor, _round_up(_cdiv(tr, 2), _SUBLANE))
    # ... then chunk the hidden dim instead of shrinking tr below 256 ...
    while _act_vmem_bytes(tr, Cp, hc) > act_budget and hc > _LANE:
        hc = _pick_hidden_chunk(Hp, hc - _LANE)
    # ... and only as a last resort drop the row tile below the floor.
    while _act_vmem_bytes(tr, Cp, hc) > act_budget and tr > _SUBLANE:
        tr = max(_SUBLANE, _round_up(_cdiv(tr, 2), _SUBLANE))

    # Multi-TensorCore parts (v7x/v4/v5p): make sure the "parallel" row axis
    # has at least two tiles so both cores get work.
    Rp = _round_up(R, tr)
    if Rp // tr == 1 and _num_tensorcores() >= 2 and tr >= 2 * _SUBLANE:
        tr = _round_up(_cdiv(tr, 2), _SUBLANE)
        Rp = _round_up(R, tr)
    num_tiles = Rp // tr
    n_chunks = Hp // hc

    # Pad activations / params to lane-dense shapes.  Padded channels stay
    # exactly zero through every layer (gamma/beta/bias pads are zero).
    x_pad = _pad_to(x.reshape(R, C), (Rp, Cp))
    g1 = _pad_to(params["g1"], (depth, 1, Cp))
    be1 = _pad_to(params["be1"], (depth, 1, Cp))
    g2 = _pad_to(params["g2"], (depth, 1, Cp))
    be2 = _pad_to(params["be2"], (depth, 1, Cp))
    b1 = _pad_to(params["b1"], (depth, 1, Hp))
    b2 = _pad_to(params["b2"], (depth, 1, Cp))
    w1 = _pad_to(params["w1"], (depth, Cp, Hp)).astype(jnp.bfloat16)
    w2 = _pad_to(params["w2"], (depth, Hp, Cp)).astype(jnp.bfloat16)

    grid = (num_tiles, depth)
    row_spec = pl.BlockSpec((tr, Cp), lambda i, l: (i, 0))
    if resident:
        # Full stacks, constant block index -> DMA'd once, kernel slices layer l.
        vecC = pl.BlockSpec((depth, 1, Cp), lambda i, l: (0, 0, 0))
        vecH = pl.BlockSpec((depth, 1, Hp), lambda i, l: (0, 0, 0))
        matCH = pl.BlockSpec((depth, Cp, Hp), lambda i, l: (0, 0, 0))
        matHC = pl.BlockSpec((depth, Hp, Cp), lambda i, l: (0, 0, 0))
    else:
        # Per-layer streaming fallback (depth axis squeezed).
        vecC = pl.BlockSpec((None, 1, Cp), lambda i, l: (l, 0, 0))
        vecH = pl.BlockSpec((None, 1, Hp), lambda i, l: (l, 0, 0))
        matCH = pl.BlockSpec((None, Cp, Hp), lambda i, l: (l, 0, 0))
        matHC = pl.BlockSpec((None, Hp, Cp), lambda i, l: (l, 0, 0))

    weight_hbm_bytes = (w_stack + vec_stack) if resident else num_tiles * (w_stack + vec_stack)
    cost = pl.CostEstimate(
        flops=int(depth * Rp * (4 * Cp * Hp + 30 * Cp + 12 * Hp)),
        transcendentals=int(depth * Rp * Hp),
        bytes_accessed=int(2 * Rp * Cp * 4 + weight_hbm_bytes),
    )

    out_pad = pl.pallas_call(
        functools.partial(cswin_fused_kernel, true_c=C, resident=resident,
                          n_chunks=n_chunks, hidden_chunk=hc),
        out_shape=jax.ShapeDtypeStruct((Rp, Cp), x.dtype),
        grid=grid,
        in_specs=[row_spec, vecC, vecC, vecC, vecC, matCH, vecH, matHC, vecC],
        out_specs=row_spec,
        scratch_shapes=[pltpu.VMEM((tr, Cp), jnp.float32)],
        compiler_params=pltpu.CompilerParams(
            dimension_semantics=("parallel", "arbitrary"),
            vmem_limit_bytes=int(budget)),
        cost_estimate=cost,
    )(x_pad, g1, be1, g2, be2, w1, b1, w2, b2)

    return out_pad[:R, :C].reshape(B, N, C)


# --------------------------- params & reference ------------------------------

def init_params(key, dim, mlp_dim, depth):
    """Deterministic synthetic params (LayerNorm default init, uniform Linear
    init), stacked along a leading depth axis."""
    def one(k):
        k1, k2, k3, k4 = jax.random.split(k, 4)
        bound1 = 1.0 / math.sqrt(dim)       # fan_in of Linear(dim, mlp_dim)
        bound2 = 1.0 / math.sqrt(mlp_dim)   # fan_in of Linear(mlp_dim, dim)
        return dict(
            g1=jnp.ones((1, dim), jnp.float32),
            be1=jnp.zeros((1, dim), jnp.float32),
            g2=jnp.ones((1, dim), jnp.float32),
            be2=jnp.zeros((1, dim), jnp.float32),
            w1=jax.random.uniform(k1, (dim, mlp_dim), jnp.float32, -bound1, bound1),
            b1=jax.random.uniform(k2, (1, mlp_dim), jnp.float32, -bound1, bound1),
            w2=jax.random.uniform(k3, (mlp_dim, dim), jnp.float32, -bound2, bound2),
            b2=jax.random.uniform(k4, (1, dim), jnp.float32, -bound2, bound2),
        )
    per_layer = [one(k) for k in jax.random.split(key, depth)]
    return {name: jnp.stack([p[name] for p in per_layer]) for name in per_layer[0]}


# Pure-JAX reference (same bf16-operand / f32-accumulate / tanh-GELU path).
def _layernorm_ref(x, gamma, beta):
    mu = jnp.mean(x, axis=-1, keepdims=True)
    var = jnp.mean(x * x, axis=-1, keepdims=True) - mu * mu
    return (x - mu) * lax.rsqrt(var + LN_EPS) * gamma + beta


def _reference_forward(x, params):
    B, N, C = x.shape
    depth = params["w1"].shape[0]
    out = x.reshape(B * N, C)
    for l in range(depth):
        y = out + _layernorm_ref(out, params["g1"][l], params["be1"][l])
        z = _layernorm_ref(y, params["g2"][l], params["be2"][l])
        h = _gelu_tanh(
            jnp.dot(z.astype(jnp.bfloat16), params["w1"][l].astype(jnp.bfloat16),
                    preferred_element_type=jnp.float32) + params["b1"][l])
        out = y + (jnp.dot(h.astype(jnp.bfloat16),
                           params["w2"][l].astype(jnp.bfloat16),
                           preferred_element_type=jnp.float32) + params["b2"][l])
    return out.reshape(B, N, C)


if __name__ == "__main__":
    # Small shapes consistent with the module: heads=8 (required by the qkv
    # h/v head split), N = h*w, h and w divisible by sw.
    B, heads, sw, h, w = 2, 8, 2, 4, 4
    dim, mlp_dim, depth = 32, 64, 2
    N = h * w                                   # 16

    key = jax.random.PRNGKey(0)
    kx, kp = jax.random.split(key)
    x = jax.random.normal(kx, (B, N, dim), jnp.float32)
    params = init_params(kp, dim, mlp_dim, depth)

    fwd = jax.jit(cswin_transformer_forward)
    out = jax.block_until_ready(fwd(x, params))

    ref = _reference_forward(x, params)
    assert out.shape == (B, N, dim)
    max_err = float(jnp.max(jnp.abs(out - ref)))
    assert jnp.allclose(out, ref, atol=3e-3, rtol=3e-3), (
        f"mismatch vs reference (max abs err {max_err:.3e})")
    print("KERNEL_OK")
</pallas_src>

<mosaic_0001>
module attributes {stable_mosaic.version = 11 : i64} {
  func.func @cswin_fused_kernel(%arg0: i32, %arg1: i32, %arg2: memref<32x128xf32, #tpu.memory_space<vmem>>, %arg3: memref<2x1x128xf32, #tpu.memory_space<vmem>>, %arg4: memref<2x1x128xf32, #tpu.memory_space<vmem>>, %arg5: memref<2x1x128xf32, #tpu.memory_space<vmem>>, %arg6: memref<2x1x128xf32, #tpu.memory_space<vmem>>, %arg7: memref<2x128x128xbf16, #tpu.memory_space<vmem>>, %arg8: memref<2x1x128xf32, #tpu.memory_space<vmem>>, %arg9: memref<2x128x128xbf16, #tpu.memory_space<vmem>>, %arg10: memref<2x1x128xf32, #tpu.memory_space<vmem>>, %arg11: memref<32x128xf32, #tpu.memory_space<vmem>>, %arg12: memref<32x128xf32, #tpu.memory_space<vmem>>) attributes {dimension_semantics = [#tpu.dimension_semantics<parallel>, #tpu.dimension_semantics<arbitrary>], iteration_bounds = array<i64: 1, 2>, scalar_prefetch = 0 : i64, scratch_operands = 1 : i64, tpu.core_type = #tpu.core_type<tc>, window_params = [{transform_indices = @transform_0, window_bounds = array<i64: 32, 128>}, {pipeline_mode = #tpu.pipeline_mode<synchronous>, transform_indices = @transform_1, window_bounds = array<i64: 2, 1, 128>}, {pipeline_mode = #tpu.pipeline_mode<synchronous>, transform_indices = @transform_2, window_bounds = array<i64: 2, 1, 128>}, {pipeline_mode = #tpu.pipeline_mode<synchronous>, transform_indices = @transform_3, window_bounds = array<i64: 2, 1, 128>}, {pipeline_mode = #tpu.pipeline_mode<synchronous>, transform_indices = @transform_4, window_bounds = array<i64: 2, 1, 128>}, {pipeline_mode = #tpu.pipeline_mode<synchronous>, transform_indices = @transform_5, window_bounds = array<i64: 2, 128, 128>}, {pipeline_mode = #tpu.pipeline_mode<synchronous>, transform_indices = @transform_6, window_bounds = array<i64: 2, 1, 128>}, {pipeline_mode = #tpu.pipeline_mode<synchronous>, transform_indices = @transform_7, window_bounds = array<i64: 2, 128, 128>}, {pipeline_mode = #tpu.pipeline_mode<synchronous>, transform_indices = @transform_8, window_bounds = array<i64: 2, 1, 128>}, {transform_indices = @transform_9, window_bounds = array<i64: 32, 128>}]} {
    %c0_i32 = arith.constant 0 : i32
    %0 = arith.cmpi eq, %arg1, %c0_i32 : i32
    %1 = arith.extui %0 : i1 to i32
    %c0_i32_0 = arith.constant 0 : i32
    %2 = arith.cmpi ne, %1, %c0_i32_0 : i32
    scf.if %2 {
      %c0_36 = arith.constant 0 : index
      %c0_37 = arith.constant 0 : index
      %101 = vector.load %arg2[%c0_36, %c0_37] : memref<32x128xf32, #tpu.memory_space<vmem>>, vector<32x128xf32>
      %c0_38 = arith.constant 0 : index
      %c0_39 = arith.constant 0 : index
      %102 = vector.load %arg12[%c0_38, %c0_39] : memref<32x128xf32, #tpu.memory_space<vmem>>, vector<32x128xf32>
      tpu.vector_store %arg12[%c0_38, %c0_39], %101 {strides = array<i32>} : memref<32x128xf32, #tpu.memory_space<vmem>>, vector<32x128xf32>,
    } else {
    }
    %c0 = arith.constant 0 : index
    %c0_1 = arith.constant 0 : index
    %3 = vector.load %arg12[%c0, %c0_1] : memref<32x128xf32, #tpu.memory_space<vmem>>, vector<32x128xf32>
    %4 = arith.index_cast %arg1 : i32 to index
    %c0_2 = arith.constant 0 : index
    %c0_3 = arith.constant 0 : index
    %5 = vector.load %arg3[%4, %c0_2, %c0_3] : memref<2x1x128xf32, #tpu.memory_space<vmem>>, vector<1x1x128xf32>
    %6 = vector.shape_cast %5 : vector<1x1x128xf32> to vector<1x128xf32>
    %7 = arith.index_cast %arg1 : i32 to index
    %c0_4 = arith.constant 0 : index
    %c0_5 = arith.constant 0 : index
    %8 = vector.load %arg4[%7, %c0_4, %c0_5] : memref<2x1x128xf32, #tpu.memory_space<vmem>>, vector<1x1x128xf32>
    %9 = vector.shape_cast %8 : vector<1x1x128xf32> to vector<1x128xf32>
    %10 = arith.index_cast %arg1 : i32 to index
    %c0_6 = arith.constant 0 : index
    %c0_7 = arith.constant 0 : index
    %11 = vector.load %arg5[%10, %c0_6, %c0_7] : memref<2x1x128xf32, #tpu.memory_space<vmem>>, vector<1x1x128xf32>
    %12 = vector.shape_cast %11 : vector<1x1x128xf32> to vector<1x128xf32>
    %13 = arith.index_cast %arg1 : i32 to index
    %c0_8 = arith.constant 0 : index
    %c0_9 = arith.constant 0 : index
    %14 = vector.load %arg6[%13, %c0_8, %c0_9] : memref<2x1x128xf32, #tpu.memory_space<vmem>>, vector<1x1x128xf32>
    %15 = vector.shape_cast %14 : vector<1x1x128xf32> to vector<1x128xf32>
    %16 = arith.index_cast %arg1 : i32 to index
    %c0_10 = arith.constant 0 : index
    %c0_11 = arith.constant 0 : index
    %17 = vector.load %arg8[%16, %c0_10, %c0_11] : memref<2x1x128xf32, #tpu.memory_space<vmem>>, vector<1x1x128xf32>
    %18 = vector.shape_cast %17 : vector<1x1x128xf32> to vector<1x128xf32>
    %19 = arith.index_cast %arg1 : i32 to index
    %c0_12 = arith.constant 0 : index
    %c0_13 = arith.constant 0 : index
    %20 = vector.load %arg10[%19, %c0_12, %c0_13] : memref<2x1x128xf32, #tpu.memory_space<vmem>>, vector<1x1x128xf32>
    %21 = vector.shape_cast %20 : vector<1x1x128xf32> to vector<1x128xf32>
    %cst = arith.constant dense<0.000000e+00> : vector<32xf32>
    %22 = vector.multi_reduction <add>, %3, %cst [1] : vector<32x128xf32> to vector<32xf32>
    %23 = vector.shape_cast %22 : vector<32xf32> to vector<32x1xf32>
    %cst_14 = arith.constant 3.125000e-02 : f32
    %24 = vector.broadcast %cst_14 : f32 to vector<32x1xf32>
    %25 = arith.mulf %23, %24 : vector<32x1xf32>
    %26 = arith.mulf %3, %3 : vector<32x128xf32>
    %cst_15 = arith.constant dense<0.000000e+00> : vector<32xf32>
    %27 = vector.multi_reduction <add>, %26, %cst_15 [1] : vector<32x128xf32> to vector<32xf32>
    %28 = vector.shape_cast %27 : vector<32xf32> to vector<32x1xf32>
    %cst_16 = arith.constant 3.125000e-02 : f32
    %29 = vector.broadcast %cst_16 : f32 to vector<32x1xf32>
    %30 = arith.mulf %28, %29 : vector<32x1xf32>
    %31 = arith.mulf %25, %25 : vector<32x1xf32>
    %32 = arith.subf %30, %31 : vector<32x1xf32>
    %33 = vector.broadcast %25 : vector<32x1xf32> to vector<32x128xf32>
    %34 = arith.subf %3, %33 : vector<32x128xf32>
    %cst_17 = arith.constant 9.99999974E-6 : f32
    %35 = vector.broadcast %cst_17 : f32 to vector<32x1xf32>
    %36 = arith.addf %32, %35 : vector<32x1xf32>
    %37 = math.rsqrt %36 : vector<32x1xf32>
    %38 = vector.broadcast %37 : vector<32x1xf32> to vector<32x128xf32>
    %39 = arith.mulf %34, %38 : vector<32x128xf32>
    %40 = vector.broadcast %6 : vector<1x128xf32> to vector<32x128xf32>
    %41 = arith.mulf %39, %40 : vector<32x128xf32>
    %42 = vector.broadcast %9 : vector<1x128xf32> to vector<32x128xf32>
    %43 = arith.addf %41, %42 : vector<32x128xf32>
    %44 = arith.addf %3, %43 : vector<32x128xf32>
    %cst_18 = arith.constant dense<0.000000e+00> : vector<32xf32>
    %45 = vector.multi_reduction <add>, %44, %cst_18 [1] : vector<32x128xf32> to vector<32xf32>
    %46 = vector.shape_cast %45 : vector<32xf32> to vector<32x1xf32>
    %cst_19 = arith.constant 3.125000e-02 : f32
    %47 = vector.broadcast %cst_19 : f32 to vector<32x1xf32>
    %48 = arith.mulf %46, %47 : vector<32x1xf32>
    %49 = arith.mulf %44, %44 : vector<32x128xf32>
    %cst_20 = arith.constant dense<0.000000e+00> : vector<32xf32>
    %50 = vector.multi_reduction <add>, %49, %cst_20 [1] : vector<32x128xf32> to vector<32xf32>
    %51 = vector.shape_cast %50 : vector<32xf32> to vector<32x1xf32>
    %cst_21 = arith.constant 3.125000e-02 : f32
    %52 = vector.broadcast %cst_21 : f32 to vector<32x1xf32>
    %53 = arith.mulf %51, %52 : vector<32x1xf32>
    %54 = arith.mulf %48, %48 : vector<32x1xf32>
    %55 = arith.subf %53, %54 : vector<32x1xf32>
    %56 = vector.broadcast %48 : vector<32x1xf32> to vector<32x128xf32>
    %57 = arith.subf %44, %56 : vector<32x128xf32>
    %cst_22 = arith.constant 9.99999974E-6 : f32
    %58 = vector.broadcast %cst_22 : f32 to vector<32x1xf32>
    %59 = arith.addf %55, %58 : vector<32x1xf32>
    %60 = math.rsqrt %59 : vector<32x1xf32>
    %61 = vector.broadcast %60 : vector<32x1xf32> to vector<32x128xf32>
    %62 = arith.mulf %57, %61 : vector<32x128xf32>
    %63 = vector.broadcast %12 : vector<1x128xf32> to vector<32x128xf32>
    %64 = arith.mulf %62, %63 : vector<32x128xf32>
    %65 = vector.broadcast %15 : vector<1x128xf32> to vector<32x128xf32>
    %66 = arith.addf %64, %65 : vector<32x128xf32>
    %67 = arith.truncf %66 : vector<32x128xf32> to vector<32x128xbf16>
    %68 = arith.index_cast %arg1 : i32 to index
    %c0_23 = arith.constant 0 : index
    %c0_24 = arith.constant 0 : index
    %69 = vector.load %arg7[%68, %c0_23, %c0_24] : memref<2x128x128xbf16, #tpu.memory_space<vmem>>, vector<1x128x128xbf16>
    %70 = vector.shape_cast %69 : vector<1x128x128xbf16> to vector<128x128xbf16>
    %71 = arith.index_cast %arg1 : i32 to index
    %c0_25 = arith.constant 0 : index
    %c0_26 = arith.constant 0 : index
    %72 = vector.load %arg9[%71, %c0_25, %c0_26] : memref<2x128x128xbf16, #tpu.memory_space<vmem>>, vector<1x128x128xbf16>
    %73 = vector.shape_cast %72 : vector<1x128x128xbf16> to vector<128x128xbf16>
    %cst_27 = arith.constant dense<0.000000e+00> : vector<32x128xf32>
    %74 = tpu.matmul %67, %70, %cst_27 {dimension_numbers = #tpu.dot_dimension_numbers<[1], [0], [0], [1], [0, 0, 1, 1], [], []>} : vector<32x128xbf16>, vector<128x128xbf16>, vector<32x128xf32> -> vector<32x128xf32>
    %75 = vector.broadcast %18 : vector<1x128xf32> to vector<32x128xf32>
    %76 = arith.addf %74, %75 : vector<32x128xf32>
    %cst_28 = arith.constant 5.000000e-01 : f32
    %77 = vector.broadcast %cst_28 : f32 to vector<32x128xf32>
    %78 = arith.mulf %77, %76 : vector<32x128xf32>
    %cst_29 = arith.constant 4.471500e-02 : f32
    %79 = vector.broadcast %cst_29 : f32 to vector<32x128xf32>
    %80 = arith.mulf %79, %76 : vector<32x128xf32>
    %81 = arith.mulf %80, %76 : vector<32x128xf32>
    %82 = arith.mulf %81, %76 : vector<32x128xf32>
    %83 = arith.addf %76, %82 : vector<32x128xf32>
    %cst_30 = arith.constant 0.797884583 : f32
    %84 = vector.broadcast %cst_30 : f32 to vector<32x128xf32>
    %85 = arith.mulf %84, %83 : vector<32x128xf32>
    %86 = math.tanh %85 : vector<32x128xf32>
    %cst_31 = arith.constant 1.000000e+00 : f32
    %87 = vector.broadcast %cst_31 : f32 to vector<32x128xf32>
    %88 = arith.addf %87, %86 : vector<32x128xf32>
    %89 = arith.mulf %78, %88 : vector<32x128xf32>
    %90 = arith.truncf %89 : vector<32x128xf32> to vector<32x128xbf16>
    %cst_32 = arith.constant dense<0.000000e+00> : vector<32x128xf32>
    %91 = tpu.matmul %90, %73, %cst_32 {dimension_numbers = #tpu.dot_dimension_numbers<[1], [0], [0], [1], [0, 0, 1, 1], [], []>} : vector<32x128xbf16>, vector<128x128xbf16>, vector<32x128xf32> -> vector<32x128xf32>
    %92 = arith.addf %44, %91 : vector<32x128xf32>
    %93 = vector.broadcast %21 : vector<1x128xf32> to vector<32x128xf32>
    %94 = arith.addf %92, %93 : vector<32x128xf32>
    %c1_i32 = arith.constant 1 : i32
    %95 = arith.cmpi slt, %arg1, %c1_i32 : i32
    %96 = arith.extui %95 : i1 to i32
    %c0_i32_33 = arith.constant 0 : i32
    %97 = arith.cmpi ne, %96, %c0_i32_33 : i32
    scf.if %97 {
      %c0_36 = arith.constant 0 : index
      %c0_37 = arith.constant 0 : index
      %101 = vector.load %arg12[%c0_36, %c0_37] : memref<32x128xf32, #tpu.memory_space<vmem>>, vector<32x128xf32>
      tpu.vector_store %arg12[%c0_36, %c0_37], %94 {strides = array<i32>} : memref<32x128xf32, #tpu.memory_space<vmem>>, vector<32x128xf32>,
    } else {
    }
    %c1_i32_34 = arith.constant 1 : i32
    %98 = arith.cmpi eq, %arg1, %c1_i32_34 : i32
    %99 = arith.extui %98 : i1 to i32
    %c0_i32_35 = arith.constant 0 : i32
    %100 = arith.cmpi ne, %99, %c0_i32_35 : i32
    scf.if %100 {
      %c0_36 = arith.constant 0 : index
      %c0_37 = arith.constant 0 : index
      %101 = vector.load %arg11[%c0_36, %c0_37] : memref<32x128xf32, #tpu.memory_space<vmem>>, vector<32x128xf32>
      tpu.vector_store %arg11[%c0_36, %c0_37], %94 {strides = array<i32>} : memref<32x128xf32, #tpu.memory_space<vmem>>, vector<32x128xf32>,
    } else {
    }
    return
  }
  func.func @transform_0(%arg0: i32, %arg1: i32) -> (i32, i32) {
    %c0_i32 = arith.constant 0 : i32
    %c0_i32_0 = arith.constant 0 : i32
    return %arg0, %c0_i32 : i32, i32
  }
  func.func @transform_1(%arg0: i32, %arg1: i32) -> (i32, i32, i32) {
    %c0_i32 = arith.constant 0 : i32
    %c0_i32_0 = arith.constant 0 : i32
    %c0_i32_1 = arith.constant 0 : i32
    %c0_i32_2 = arith.constant 0 : i32
    return %c0_i32, %c0_i32_0, %c0_i32_1 : i32, i32, i32
  }
  func.func @transform_2(%arg0: i32, %arg1: i32) -> (i32, i32, i32) {
    %c0_i32 = arith.constant 0 : i32
    %c0_i32_0 = arith.constant 0 : i32
    %c0_i32_1 = arith.constant 0 : i32
    %c0_i32_2 = arith.constant 0 : i32
    return %c0_i32, %c0_i32_0, %c0_i32_1 : i32, i32, i32
  }
  func.func @transform_3(%arg0: i32, %arg1: i32) -> (i32, i32, i32) {
    %c0_i32 = arith.constant 0 : i32
    %c0_i32_0 = arith.constant 0 : i32
    %c0_i32_1 = arith.constant 0 : i32
    %c0_i32_2 = arith.constant 0 : i32
    return %c0_i32, %c0_i32_0, %c0_i32_1 : i32, i32, i32
  }
  func.func @transform_4(%arg0: i32, %arg1: i32) -> (i32, i32, i32) {
    %c0_i32 = arith.constant 0 : i32
    %c0_i32_0 = arith.constant 0 : i32
    %c0_i32_1 = arith.constant 0 : i32
    %c0_i32_2 = arith.constant 0 : i32
    return %c0_i32, %c0_i32_0, %c0_i32_1 : i32, i32, i32
  }
  func.func @transform_5(%arg0: i32, %arg1: i32) -> (i32, i32, i32) {
    %c0_i32 = arith.constant 0 : i32
    %c0_i32_0 = arith.constant 0 : i32
    %c0_i32_1 = arith.constant 0 : i32
    %c0_i32_2 = arith.constant 0 : i32
    return %c0_i32, %c0_i32_0, %c0_i32_1 : i32, i32, i32
  }
  func.func @transform_6(%arg0: i32, %arg1: i32) -> (i32, i32, i32) {
    %c0_i32 = arith.constant 0 : i32
    %c0_i32_0 = arith.constant 0 : i32
    %c0_i32_1 = arith.constant 0 : i32
    %c0_i32_2 = arith.constant 0 : i32
    return %c0_i32, %c0_i32_0, %c0_i32_1 : i32, i32, i32
  }
  func.func @transform_7(%arg0: i32, %arg1: i32) -> (i32, i32, i32) {
    %c0_i32 = arith.constant 0 : i32
    %c0_i32_0 = arith.constant 0 : i32
    %c0_i32_1 = arith.constant 0 : i32
    %c0_i32_2 = arith.constant 0 : i32
    return %c0_i32, %c0_i32_0, %c0_i32_1 : i32, i32, i32
  }
  func.func @transform_8(%arg0: i32, %arg1: i32) -> (i32, i32, i32) {
    %c0_i32 = arith.constant 0 : i32
    %c0_i32_0 = arith.constant 0 : i32
    %c0_i32_1 = arith.constant 0 : i32
    %c0_i32_2 = arith.constant 0 : i32
    return %c0_i32, %c0_i32_0, %c0_i32_1 : i32, i32, i32
  }
  func.func @transform_9(%arg0: i32, %arg1: i32) -> (i32, i32) {
    %c0_i32 = arith.constant 0 : i32
    %c0_i32_0 = arith.constant 0 : i32
    return %arg0, %c0_i32 : i32, i32
  }
}

</mosaic_0001>

<bundles_post_ra>
// kernel: cswin_transformer_forward.1
= control target key start
LH: loop header
LB: loop body
LE: loop exit
PB: predicated region body
PF: predicated region fallthrough
CT: control target
= control target key end

     0   :  { %14 = vsyncpa [#allocation4], 0  ;;  %s1177_s30 = smov 0   ;;  %s1179_s10 = smov 0   ;;  %s1363_s0 = inlined_call_operand.vmem [shape: f32[32,128], index: 0, kind: input, shape index: {}]   ;;  %s1364_s1 = inlined_call_operand.vmem [shape: f32[2,1,128], index: 1, kind: input, shape index: {}]   ;;  %s1365_s2 = inlined_call_operand.vmem [shape: f32[2,1,128], index: 2, kind: input, shape index: {}]   ;;  %s1366_s3 = inlined_call_operand.vmem [shape: f32[2,1,128], index: 3, kind: input, shape index: {}]   ;;  %s1367_s4 = inlined_call_operand.vmem [shape: f32[2,1,128], index: 4, kind: input, shape index: {}]   ;;  %s1368_s5 = inlined_call_operand.vmem [shape: bf16[2,128,128], index: 5, kind: input, shape index: {}]   ;;  %s1369_s6 = inlined_call_operand.vmem [shape: f32[2,1,128], index: 6, kind: input, shape index: {}]   ;;  %s1370_s7 = inlined_call_operand.vmem [shape: bf16[2,128,128], index: 7, kind: input, shape index: {}]   ;;  %s1371_s8 = inlined_call_operand.vmem [shape: f32[2,1,128], index: 8, kind: input, shape index: {}]   ;;  %s1372_s9 = inlined_call_operand.hbm [shape: f32[32,128], index: 9, kind: output, shape index: {}]  }
   0x1   :  { %s1181_s11 = smov 0  }
   0x2 LB: > { %s893_s12 = sadd.s32 4294967295, %s1122_s11   ;;  %s29_s13 = sadd.s32 1, %s1118_s10  ;;  %s1122_s11 = sphi %s1181_s11, %s20_s11   ;;  %s1118_s10 = sphi %s1179_s10, %s1374_s10   ;;  %s1114_s30 = sphi %s1177_s30, %s1373_s30  }
   0x3   : > { %p30_p0 = scmp.ge.s32.totalorder %s29_s13, 2  ;;  %p896_p1 = scmp.ge.s32.totalorder %s1122_s11, 1 }
   0x4   : > { %p301_p2 = scmp.lt.s32.totalorder %s1122_s11, 3 }
   0x5   : > { %s1376_s13 = smov (%p30_p0, %s29_s13), 0 }
   0x6   : > { %p302_p3 = pnand %p896_p1, %p301_p2 }
   0x7   : > { %p897_p4 = scmp.ne.s32.totalorder (!%p302_p3), %s1114_s30, 0 }
   0x8   : > { %305 = sbr.rel (%p302_p3) target bundleno = 668 (0x29c), region = 56 }
   0xd   : > { %342 = sbr.rel (%p897_p4) target bundleno = 23 (0x17), region = 60 }
  0x12   : > { %v343_v0 = vld [vmem:[%s1363_s0] sm:$0xff]  ;;  %v344_v1 = vld [vmem:[%s1363_s0 + $0x8] sm:$0xff]  ;;  %v345_v2 = vld [vmem:[%s1363_s0 + $0x10] sm:$0xff] }
  0x13   : > { %347 = vst [vmem:[#allocation2 + $0x10] sm:$0xff] %v343_v0  ;;  %v346_v3 = vld [vmem:[%s1363_s0 + $0x18] sm:$0xff] }
  0x14   : > { %348 = vst [vmem:[#allocation2] sm:$0xff] %v344_v1 }
  0x15   : > { %349 = vst [vmem:[#allocation2 + $0x18] sm:$0xff] %v345_v2 }
  0x16   : > { %350 = vst [vmem:[#allocation2 + $0x8] sm:$0xff] %v346_v3 }
  0x17 PF: > { %s355_s24 = scalar_lea.vmem %s1364_s1, %s1114_s30  ;;  %s357_s27 = scalar_lea.vmem %s1365_s2, %s1114_s30 }
  0x18   : > { %v1038_v49 = vld [vmem:[%s355_s24] ss:$0 sm:$0xff]  ;;  %s359_s18 = scalar_lea.vmem %s1366_s3, %s1114_s30  ;;  %s361_s21 = scalar_lea.vmem %s1367_s4, %s1114_s30 }
  0x19   : > { %v1039_v53 = vld [vmem:[%s357_s27] ss:$0 sm:$0xff]  ;;  %s363_s24 = scalar_lea.vmem %s1369_s6, %s1114_s30  ;;  %s971_s25 = sshll.u32 %s1114_s30, 6 }
  0x1a   : > { %v1213_v5 = vld [vmem:[#allocation2 + $0x10] sm:$0xff]  ;;  %s579_s28 = scalar_lea.vmem %s1368_s5, %s971_s25  ;;  %s365_s19 = scalar_lea.vmem %s1371_s8, %s1114_s30 }
  0x1b   : > { %367 = vadd.xlane.f32.xlu2 %v1213_v5  ;;  %v1221_v8 = vld [vmem:[#allocation2] sm:$0xff]  ;;  %v379_v10 = vmul.f32 %v1213_v5, %v1213_v5  ;;  %s597_s22 = scalar_lea.vmem %s1370_s7, %s971_s25  ;;  %p965_p5 = scmp.ge.s32.totalorder %s1114_s30, 1 }
  0x1c   : > { %v1211_v4 = vld [vmem:[#allocation2 + $0x18] sm:$0xff]  ;;  %v380_v11 = vmul.f32 %v1221_v8, %v1221_v8 }
  0x1d   : > { %371 = vadd.xlane.f32.xlu0 %v1211_v4  ;;  %v381_v6 = vmul.f32 %v1211_v4, %v1211_v4  ;;  %v1219_v7 = vld [vmem:[#allocation2 + $0x8] sm:$0xff] }
  0x1e   : > { %v382_v9 = vmul.f32 %v1219_v7, %v1219_v7 }
  0x1f   : > { %387 = vadd.xlane.f32.xlu1 %v381_v6 }
  0x23   : > { %369 = vadd.xlane.f32.xlu2 %v1221_v8 }
  0x25   : > { %373 = vadd.xlane.f32.xlu0 %v1219_v7 }
  0x27   : > { %389 = vadd.xlane.f32.xlu1 %v382_v9 }
  0x2d   : > { %383 = vadd.xlane.f32.xlu0 %v379_v10 }
  0x2f   : > { %385 = vadd.xlane.f32.xlu1 %v380_v11 }
  0x8e   : > { %v368_v13 = vpop.xlane.xlu2 %367 }
  0x8f   : > { %v1239_v25 = vmul.f32 0.03125, %v368_v13 }
  0x90   : > { %v372_v12 = vpop.xlane.xlu0 %371 }
  0x91   : > { %v377_v14 = vmul.f32 0.03125, %v372_v12  ;;  %v395_v30 = vmul.f32 %v1239_v25, %v1239_v25 }
  0x92   : > { %v388_v15 = vpop.xlane.xlu1 %387 }
  0x93   : > { %v397_v16 = vmul.f32 %v377_v14, %v377_v14  ;;  %v393_v17 = vmul.f32 0.03125, %v388_v15  ;;  %v405_v48 = vsub.f32 %v1211_v4, %v377_v14 }
  0x95   : > { %v401_v18 = vsub.f32 %v393_v17, %v397_v16 }
  0x96   : > { %v370_v23 = vpop.xlane.xlu2 %369 }
  0x97   : > { %v409_v19 = vadd.f32 1e-05, %v401_v18  ;;  %v1241_v28 = vmul.f32 0.03125, %v370_v23 }
  0x98   : > { %v374_v20 = vpop.xlane.xlu0 %373 }
  0x99   : > { %1044 = vrsqrt.f32 %v409_v19  ;;  %v378_v21 = vmul.f32 0.03125, %v374_v20  ;;  %v396_v34 = vmul.f32 %v1241_v28, %v1241_v28  ;;  %vm437_vm1 = vweird.f32 %v409_v19 }
  0x9a   : > { %v390_v22 = vpop.xlane.xlu1 %389 }
  0x9b   : > { %v398_v24 = vmul.f32 %v378_v21, %v378_v21  ;;  %v394_v26 = vmul.f32 0.03125, %v390_v22  ;;  %v406_v0 = vsub.f32 %v1219_v7, %v378_v21 }
  0x9d   : > { %v402_v27 = vsub.f32 %v394_v26, %v398_v24 }
  0x9f   : > { %v1045_v29 = vpop.eup %1044  ;;  %v410_v31 = vadd.f32 1e-05, %v402_v27 }
  0xa0   : > { %v432_v32 = vmul.f32 %v1045_v29, %v409_v19  ;;  %v384_v33 = vpop.xlane.xlu0 %383  ;;  %vm438_vm0 = vweird.f32 %v1045_v29  ;;  %v404_v19 = vsub.f32 %v1221_v8, %v1241_v28 }
  0xa1   : > { %1046 = vrsqrt.f32 %v410_v31  ;;  %v391_v35 = vmul.f32 0.03125, %v384_v33  ;;  %vm439_vm2 = vmor %vm437_vm1, %vm438_vm0  ;;  %vm447_vm4 = vweird.f32 %v410_v31  ;;  %v976_v33 = vld [vmem:[%s579_s28 + $0x20] sm:$0xff] }
  0xa2   : > { %v433_v36 = vmul.f32 %v1045_v29, %v432_v32  ;;  %v386_v37 = vpop.xlane.xlu1 %385  ;;  %v977_v32 = vld [vmem:[%s579_s28 + $0x28] sm:$0xff] }
  0xa3   : > { %v399_v38 = vsub.f32 %v391_v35, %v395_v30  ;;  %v392_v39 = vmul.f32 0.03125, %v386_v37  ;;  %v974_v35 = vld [vmem:[%s579_s28 + $0x10] sm:$0xff] }
  0xa4   : > { %v434_v40 = vmul.f32 0.5, %v433_v36 }
  0xa5   : > { %v407_v41 = vadd.f32 1e-05, %v399_v38  ;;  %v400_v42 = vsub.f32 %v392_v39, %v396_v34  ;;  %v975_v34 = vld [vmem:[%s579_s28 + $0x18] sm:$0xff] }
  0xa6   : > { %v435_v43 = vsub.f32 1.5, %v434_v40 }
  0xa7   : > { %v1047_v44 = vpop.eup %1046  ;;  %1048 = vrsqrt.f32 %v407_v41  ;;  %v408_v45 = vadd.f32 1e-05, %v400_v42  ;;  %vm417_vm7 = vweird.f32 %v407_v41 }
  0xa8   : > { %v436_v46 = vmul.f32 %v1045_v29, %v435_v43  ;;  %v442_v47 = vmul.f32 %v1047_v44, %v410_v31  ;;  %vm448_vm3 = vweird.f32 %v1047_v44  ;;  %v978_v31 = vld [vmem:[%s579_s28 + $0x30] sm:$0xff] }
  0xa9   : > { %1050 = vrsqrt.f32 %v408_v45  ;;  %vm449_vm5 = vmor %vm447_vm4, %vm448_vm3  ;;  %vm427_vm8 = vweird.f32 %v408_v45 }
  0xaa   : > { %v440_v50 = vsel %vm439_vm2, %v1045_v29, %v436_v46  ;;  %v443_v51 = vmul.f32 %v1047_v44, %v442_v47 }
  0xab   : > { %v453_v52 = vmul.f32 %v440_v50, %v405_v48 }
  0xac   : > { %v444_v54 = vmul.f32 0.5, %v443_v51 }
  0xad   : > { %v1049_v55 = vpop.eup %1048  ;;  %v460_v56 = vmul.f32 %v1038_v49, %v453_v52 }
  0xae   : > { %v445_v57 = vsub.f32 1.5, %v444_v54  ;;  %v412_v58 = vmul.f32 %v1049_v55, %v407_v41  ;;  %vm418_vm6 = vweird.f32 %v1049_v55  ;;  %v973_v41 = vld [vmem:[%s579_s28 + $0x8] sm:$0xff] }
  0xaf   : > { %v1051_v59 = vpop.eup %1050  ;;  %v467_v60 = vadd.f32 %v1039_v53, %v460_v56  ;;  %vm419_vm10 = vmor %vm417_vm7, %vm418_vm6 }
  0xb0   : > { %v446_v61 = vmul.f32 %v1047_v44, %v445_v57  ;;  %v413_v62 = vmul.f32 %v1049_v55, %v412_v58  ;;  %v422_v63 = vmul.f32 %v1051_v59, %v408_v45  ;;  %vm428_vm9 = vweird.f32 %v1051_v59 }
  0xb1   : > { %v1260_v1 = vadd.f32 %v467_v60, %v1211_v4  ;;  %v403_v4 = vsub.f32 %v1213_v5, %v1239_v25  ;;  %vm429_vm11 = vmor %vm427_vm8, %vm428_vm9 }
  0xb2   : > { %v450_v2 = vsel %vm449_vm5, %v1047_v44, %v446_v61  ;;  %v414_v3 = vmul.f32 0.5, %v413_v62  ;;  %v423_v6 = vmul.f32 %v1051_v59, %v422_v63  ;;  %v972_v44 = vld [vmem:[%s579_s28] sm:$0xff] }
  0xb3   : > { %v454_v9 = vmul.f32 %v450_v2, %v406_v0  ;;  %477 = vadd.xlane.f32.xlu2 %v1260_v1  ;;  %v487_v10 = vmul.f32 %v1260_v1, %v1260_v1 }
  0xb4   : > { %v415_v11 = vsub.f32 1.5, %v414_v3  ;;  %v424_v12 = vmul.f32 0.5, %v423_v6 }
  0xb5   : > { %493 = vadd.xlane.f32.xlu1 %v487_v10  ;;  %v461_v13 = vmul.f32 %v1038_v49, %v454_v9 }
  0xb6   : > { %v416_v14 = vmul.f32 %v1049_v55, %v415_v11  ;;  %v425_v15 = vsub.f32 1.5, %v424_v12 }
  0xb7   : > { %v468_v16 = vadd.f32 %v1039_v53, %v461_v13 }
  0xb8   : > { %v420_v17 = vsel %vm419_vm10, %v1049_v55, %v416_v14  ;;  %v426_v18 = vmul.f32 %v1051_v59, %v425_v15 }
  0xb9   : > { %v451_v20 = vmul.f32 %v420_v17, %v403_v4  ;;  %v1270_v21 = vadd.f32 %v468_v16, %v1219_v7 }
  0xba   : > { %v430_v22 = vsel %vm429_vm11, %v1051_v59, %v426_v18 }
  0xbb   : > { %v452_v23 = vmul.f32 %v430_v22, %v404_v19  ;;  %479 = vadd.xlane.f32.xlu0 %v1270_v21  ;;  %v488_v24 = vmul.f32 %v1270_v21, %v1270_v21  ;;  %v458_v25 = vmul.f32 %v1038_v49, %v451_v20  ;;  %v1040_v20 = vld [vmem:[%s359_s18] ss:$0 sm:$0xff] }
  0xbd   : > { %495 = vadd.xlane.f32.xlu2 %v488_v24  ;;  %v459_v26 = vmul.f32 %v1038_v49, %v452_v23  ;;  %v465_v27 = vadd.f32 %v1039_v53, %v458_v25 }
  0xbf   : > { %v466_v28 = vadd.f32 %v1039_v53, %v459_v26  ;;  %v1276_v29 = vadd.f32 %v465_v27, %v1213_v5 }
  0xc1   : > { %v1279_v7 = vadd.f32 %v466_v28, %v1221_v8  ;;  %v485_v30 = vmul.f32 %v1276_v29, %v1276_v29  ;;  %v979_v8 = vld [vmem:[%s579_s28 + $0x38] sm:$0xff] }
  0xc2   : > { %989 = vmatpush.bf16.msra.mxu2 %v979_v8  ;;  %665 = vmatpush.bf16.msra.mxu0 %v979_v8 }
  0xc3   : > { %475 = vadd.xlane.f32.xlu1 %v1279_v7  ;;  %473 = vadd.xlane.f32.xlu0 %v1276_v29  ;;  %v486_v5 = vmul.f32 %v1279_v7, %v1279_v7 }
  0xc5   : > { %489 = vadd.xlane.f32.xlu2 %v485_v30 }
  0xc6   : > { %990 = vmatpush.bf16.msra.mxu2 %v978_v31  ;;  %666 = vmatpush.bf16.msra.mxu0 %v978_v31 }
  0xca   : > { %991 = vmatpush.bf16.msra.mxu2 %v977_v32  ;;  %667 = vmatpush.bf16.msra.mxu0 %v977_v32 }
  0xcb   : > { %491 = vadd.xlane.f32.xlu0 %v486_v5  ;;  %v1041_v5 = vld [vmem:[%s361_s21] ss:$0 sm:$0xff] }
  0xce   : > { %992 = vmatpush.bf16.msra.mxu2 %v976_v33  ;;  %668 = vmatpush.bf16.msra.mxu0 %v976_v33 }
  0xd2   : > { %993 = vmatpush.bf16.msra.mxu2 %v975_v34  ;;  %669 = vmatpush.bf16.msra.mxu0 %v975_v34 }
  0xd6   : > { %994 = vmatpush.bf16.msra.mxu2 %v974_v35  ;;  %670 = vmatpush.bf16.msra.mxu0 %v974_v35 }
  0xda   : > { %995 = vmatpush.bf16.msra.mxu2 %v973_v41  ;;  %671 = vmatpush.bf16.msra.mxu0 %v973_v41 }
  0xde   : > { %996 = vmatpush.bf16.msra.mxu2 %v972_v44  ;;  %672 = vmatpush.bf16.msra.mxu0 %v972_v44 }
 0x126   : > { %v478_v36 = vpop.xlane.xlu2 %477 }
 0x127   : > { %v483_v37 = vmul.f32 0.03125, %v478_v36 }
 0x128   : > { %v494_v38 = vpop.xlane.xlu1 %493 }
 0x129   : > { %v503_v39 = vmul.f32 %v483_v37, %v483_v37  ;;  %v499_v40 = vmul.f32 0.03125, %v494_v38  ;;  %v511_v16 = vsub.f32 %v1260_v1, %v483_v37 }
 0x12b   : > { %v507_v42 = vsub.f32 %v499_v40, %v503_v39 }
 0x12d   : > { %v515_v43 = vadd.f32 1e-05, %v507_v42 }
 0x12e   : > { %v480_v45 = vpop.xlane.xlu0 %479 }
 0x12f   : > { %1052 = vrsqrt.f32 %v515_v43  ;;  %v484_v46 = vmul.f32 0.03125, %v480_v45  ;;  %vm543_vm13 = vweird.f32 %v515_v43 }
 0x130   : > { %v496_v47 = vpop.xlane.xlu2 %495 }
 0x131   : > { %v504_v48 = vmul.f32 %v484_v46, %v484_v46  ;;  %v500_v49 = vmul.f32 0.03125, %v496_v47  ;;  %v512_v24 = vsub.f32 %v1270_v21, %v484_v46 }
 0x133   : > { %v508_v50 = vsub.f32 %v500_v49, %v504_v48 }
 0x135   : > { %v1053_v51 = vpop.eup %1052  ;;  %v516_v52 = vadd.f32 1e-05, %v508_v50 }
 0x136   : > { %v538_v53 = vmul.f32 %v1053_v51, %v515_v43  ;;  %v474_v54 = vpop.xlane.xlu0 %473  ;;  %v476_v57 = vpop.xlane.xlu1 %475  ;;  %vm544_vm12 = vweird.f32 %v1053_v51 }
 0x137   : > { %1054 = vrsqrt.f32 %v516_v52  ;;  %v1305_v55 = vmul.f32 0.03125, %v474_v54  ;;  %v482_v62 = vmul.f32 0.03125, %v476_v57  ;;  %vm545_vm14 = vmor %vm543_vm13, %vm544_vm12  ;;  %vm553_vm0 = vweird.f32 %v516_v52  ;;  %v988_v54 = vld [vmem:[%s597_s22 + $0x38] sm:$0xff]  ;;  %v985_v57 = vld [vmem:[%s597_s22 + $0x20] sm:$0xff] }
 0x138   : > { %v539_v56 = vmul.f32 %v1053_v51, %v538_v53  ;;  %v490_v58 = vpop.xlane.xlu2 %489  ;;  %997 = vmatpush.bf16.msra.mxu3 %v988_v54  ;;  %770 = vmatpush.bf16.msra.mxu1 %v988_v54 }
 0x139   : > { %v501_v59 = vmul.f32 %v1305_v55, %v1305_v55  ;;  %v497_v61 = vmul.f32 0.03125, %v490_v58  ;;  %v502_v11 = vmul.f32 %v482_v62, %v482_v62  ;;  %v509_v41 = vsub.f32 %v1276_v29, %v1305_v55  ;;  %v987_v55 = vld [vmem:[%s597_s22 + $0x30] sm:$0xff]  ;;  %v984_v58 = vld [vmem:[%s597_s22 + $0x18] sm:$0xff] }
 0x13a   : > { %v540_v60 = vmul.f32 0.5, %v539_v56  ;;  %v510_v46 = vsub.f32 %v1279_v7, %v482_v62  ;;  %v986_v56 = vld [vmem:[%s597_s22 + $0x28] sm:$0xff]  ;;  %v1042_v62 = vld [vmem:[%s363_s24] ss:$0 sm:$0xff] }
 0x13b   : > { %v505_v0 = vsub.f32 %v497_v61, %v501_v59  ;;  %v983_v59 = vld [vmem:[%s597_s22 + $0x10] sm:$0xff]  ;;  %v981_v61 = vld [vmem:[%s597_s22] sm:$0xff] }
 0x13c   : > { %v541_v63 = vsub.f32 1.5, %v540_v60  ;;  %998 = vmatpush.bf16.msra.mxu3 %v987_v55  ;;  %771 = vmatpush.bf16.msra.mxu1 %v987_v55  ;;  %v982_v60 = vld [vmem:[%s597_s22 + $0x8] sm:$0xff] }
 0x13d   : > { %v1055_v2 = vpop.eup %1054  ;;  %v513_v9 = vadd.f32 1e-05, %v505_v0 }
 0x13e   : > { %v542_v3 = vmul.f32 %v1053_v51, %v541_v63  ;;  %v548_v6 = vmul.f32 %v1055_v2, %v516_v52  ;;  %v492_v10 = vpop.xlane.xlu0 %491  ;;  %vm554_vm15 = vweird.f32 %v1055_v2 }
 0x13f   : > { %v498_v12 = vmul.f32 0.03125, %v492_v10  ;;  %1056 = vrsqrt.f32 %v513_v9  ;;  %vm555_vm1 = vmor %vm553_vm0, %vm554_vm15  ;;  %vm523_vm3 = vweird.f32 %v513_v9 }
 0x140   : > { %v549_v13 = vmul.f32 %v1055_v2, %v548_v6  ;;  %v546_v4 = vsel %vm545_vm14, %v1053_v51, %v542_v3  ;;  %999 = vmatpush.bf16.msra.mxu3 %v986_v56  ;;  %772 = vmatpush.bf16.msra.mxu1 %v986_v56 }
 0x141   : > { %v506_v14 = vsub.f32 %v498_v12, %v502_v11  ;;  %v559_v19 = vmul.f32 %v546_v4, %v511_v16 }
 0x142   : > { %v550_v15 = vmul.f32 0.5, %v549_v13 }
 0x143   : > { %v514_v17 = vadd.f32 1e-05, %v506_v14  ;;  %v566_v30 = vmul.f32 %v1040_v20, %v559_v19 }
 0x144   : > { %v551_v18 = vsub.f32 1.5, %v550_v15  ;;  %1000 = vmatpush.bf16.msra.mxu3 %v985_v57  ;;  %773 = vmatpush.bf16.msra.mxu1 %v985_v57 }
 0x145   : > { %1058 = vrsqrt.f32 %v514_v17  ;;  %v1057_v22 = vpop.eup %1056  ;;  %v573_v35 = vadd.f32 %v1041_v5, %v566_v30  ;;  %vm533_vm6 = vweird.f32 %v514_v17 }
 0x146   : > { %v552_v23 = vmul.f32 %v1055_v2, %v551_v18  ;;  %v518_v25 = vmul.f32 %v1057_v22, %v513_v9  ;;  %vm524_vm2 = vweird.f32 %v1057_v22 }
 0x147   : > { %vm525_vm4 = vmor %vm523_vm3, %vm524_vm2 }
 0x148   : > { %v556_v26 = vsel %vm555_vm1, %v1055_v2, %v552_v23  ;;  %v519_v27 = vmul.f32 %v1057_v22, %v518_v25  ;;  %1001 = vmatpush.bf16.msra.mxu3 %v984_v58  ;;  %774 = vmatpush.bf16.msra.mxu1 %v984_v58 }
 0x149   : > { %v560_v28 = vmul.f32 %v556_v26, %v512_v24 }
 0x14a   : > { %v520_v31 = vmul.f32 0.5, %v519_v27 }
 0x14b   : > { %v1059_v8 = vpop.eup %1058  ;;  %v567_v32 = vmul.f32 %v1040_v20, %v560_v28 }
 0x14c   : > { %v528_v33 = vmul.f32 %v1059_v8, %v514_v17  ;;  %v521_v34 = vsub.f32 1.5, %v520_v31  ;;  %vm534_vm5 = vweird.f32 %v1059_v8  ;;  %1002 = vmatpush.bf16.msra.mxu3 %v983_v59  ;;  %775 = vmatpush.bf16.msra.mxu1 %v983_v59 }
 0x14d   : > { %v574_v36 = vadd.f32 %v1041_v5, %v567_v32  ;;  %vm535_vm7 = vmor %vm533_vm6, %vm534_vm5 }
 0x14e   : > { %v529_v37 = vmul.f32 %v1059_v8, %v528_v33  ;;  %v522_v38 = vmul.f32 %v1057_v22, %v521_v34 }
 0x14f   : > { %v576_v39 = vpack.c.bf16 %v574_v36, %v573_v35 }
 0x150   : > { %v530_v40 = vmul.f32 0.5, %v529_v37  ;;  %v526_v42 = vsel %vm525_vm4, %v1057_v22, %v522_v38  ;;  %1003 = vmatpush.bf16.msra.mxu3 %v982_v60  ;;  %776 = vmatpush.bf16.msra.mxu1 %v982_v60 }
 0x151   : > { %678 = vmatmul.bf16.vlgmr.msra.gmra.mxu2 %v576_v39  ;;  %v557_v44 = vmul.f32 %v526_v42, %v509_v41 }
 0x152   : > { %v531_v43 = vsub.f32 1.5, %v530_v40 }
 0x153   : > { %v564_v49 = vmul.f32 %v1040_v20, %v557_v44 }
 0x154   : > { %v532_v45 = vmul.f32 %v1059_v8, %v531_v43  ;;  %1004 = vmatpush.bf16.msra.mxu3 %v981_v61  ;;  %777 = vmatpush.bf16.msra.mxu1 %v981_v61 }
 0x155   : > { %v571_v51 = vadd.f32 %v1041_v5, %v564_v49  ;;  %v1043_v49 = vld [vmem:[%s365_s19] ss:$0 sm:$0xff] }
 0x156   : > { %v536_v47 = vsel %vm535_vm7, %v1059_v8, %v532_v45 }
 0x157   : > { %v558_v48 = vmul.f32 %v536_v47, %v510_v46 }
 0x159   : > { %v565_v50 = vmul.f32 %v1040_v20, %v558_v48 }
 0x15b   : > { %v572_v52 = vadd.f32 %v1041_v5, %v565_v50 }
 0x15d   : > { %v575_v53 = vpack.c.bf16 %v572_v52, %v571_v51 }
 0x15f   : > { %673 = vmatmul.bf16.vlgmr.msra.gmra.mxu0 %v575_v53 }
 0x1d4   : > { %v679_v63 = vpop.f32.mrf.mxu2 }
 0x1d5   : > { %v680_v0 = vadd.f32 %v1042_v62, %v679_v63 }
 0x1d7   : > { %v690_v2 = vmul.f32 0.044715, %v680_v0  ;;  %v686_v34 = vmul.f32 0.5, %v680_v0 }
 0x1d9   : > { %v694_v3 = vmul.f32 %v690_v2, %v680_v0 }
 0x1db   : > { %v698_v6 = vmul.f32 %v694_v3, %v680_v0 }
 0x1dc   : > { %v674_v9 = vpop.f32.mrf.mxu0  ;;  %v681_v10 = vpop.f32.mrf.mxu2 }
 0x1dd   : > { %v675_v11 = vadd.f32 %v1042_v62, %v674_v9  ;;  %v682_v12 = vadd.f32 %v1042_v62, %v681_v10  ;;  %v702_v13 = vadd.f32 %v698_v6, %v680_v0 }
 0x1df   : > { %v688_v14 = vmul.f32 0.044715, %v675_v11  ;;  %v691_v15 = vmul.f32 0.044715, %v682_v12  ;;  %v706_v16 = vmul.f32 0.7978846, %v702_v13 }
 0x1e0   : > { %v687_v35 = vmul.f32 0.5, %v682_v12  ;;  %v684_v43 = vmul.f32 0.5, %v675_v11 }
 0x1e1   : > { %v695_v4 = vmul.f32 %v691_v15, %v682_v12  ;;  %v692_v17 = vmul.f32 %v688_v14, %v675_v11  ;;  %1060 = vtanh.f32 %v706_v16 }
 0x1e3   : > { %v699_v18 = vmul.f32 %v695_v4, %v682_v12  ;;  %v696_v19 = vmul.f32 %v692_v17, %v675_v11 }
 0x1e4   : > { %v676_v20 = vpop.f32.mrf.mxu0 }
 0x1e5   : > { %v677_v22 = vadd.f32 %v1042_v62, %v676_v20  ;;  %v703_v23 = vadd.f32 %v699_v18, %v682_v12  ;;  %v700_v24 = vadd.f32 %v696_v19, %v675_v11 }
 0x1e7   : > { %v689_v25 = vmul.f32 0.044715, %v677_v22  ;;  %v707_v26 = vmul.f32 0.7978846, %v703_v23  ;;  %v704_v28 = vmul.f32 0.7978846, %v700_v24  ;;  %v1061_v30 = vpop.eup %1060 }
 0x1e8   : > { %v714_v31 = vadd.f32 1.0, %v1061_v30  ;;  %v685_v44 = vmul.f32 0.5, %v677_v22 }
 0x1e9   : > { %1062 = vtanh.f32 %v707_v26  ;;  %v693_v27 = vmul.f32 %v689_v25, %v677_v22 }
 0x1ea   : > { %1064 = vtanh.f32 %v704_v28  ;;  %v718_v37 = vmul.f32 %v714_v31, %v686_v34 }
 0x1eb   : > { %v697_v5 = vmul.f32 %v693_v27, %v677_v22 }
 0x1ed   : > { %v701_v8 = vadd.f32 %v697_v5, %v677_v22 }
 0x1ef   : > { %v1063_v32 = vpop.eup %1062  ;;  %v705_v33 = vmul.f32 0.7978846, %v701_v8 }
 0x1f0   : > { %v715_v36 = vadd.f32 1.0, %v1063_v32  ;;  %v1065_v39 = vpop.eup %1064 }
 0x1f1   : > { %1066 = vtanh.f32 %v705_v33  ;;  %v712_v41 = vadd.f32 1.0, %v1065_v39 }
 0x1f2   : > { %v719_v38 = vmul.f32 %v715_v36, %v687_v35 }
 0x1f3   : > { %v716_v46 = vmul.f32 %v712_v41, %v684_v43 }
 0x1f4   : > { %v721_v40 = vpack.c.bf16 %v719_v38, %v718_v37 }
 0x1f6   : > { %783 = vmatmul.bf16.vlgmr.msra.gmra.mxu3 %v721_v40 }
 0x1f7   : > { %v1067_v42 = vpop.eup %1066 }
 0x1f8   : > { %v713_v45 = vadd.f32 1.0, %v1067_v42 }
 0x1fa   : > { %v717_v47 = vmul.f32 %v713_v45, %v685_v44 }
 0x1fc   : > { %v720_v48 = vpack.c.bf16 %v717_v47, %v716_v46 }
 0x1fe   : > { %778 = vmatmul.bf16.vlgmr.msra.gmra.mxu1 %v720_v48 }
 0x279   : > { %v784_v50 = vpop.f32.mrf.mxu3 }
 0x27a   : > { %v791_v51 = vadd.f32 %v784_v50, %v1260_v1 }
 0x27b   : > { %v779_v52 = vpop.f32.mrf.mxu1 }
 0x27c   : > { %v798_v53 = vadd.f32 %v1043_v49, %v791_v51  ;;  %v789_v54 = vadd.f32 %v779_v52, %v1276_v29 }
 0x27e   : > { %v796_v55 = vadd.f32 %v1043_v49, %v789_v54 }
 0x281   : > { %v786_v56 = vpop.f32.mrf.mxu3 }
 0x282   : > { %v792_v57 = vadd.f32 %v786_v56, %v1270_v21  ;;  %803 = sbr.rel (%p965_p5) target bundleno = 651 (0x28b), region = 64 }
 0x283   : > { %v781_v58 = vpop.f32.mrf.mxu1 }
 0x284   : > { %v799_v59 = vadd.f32 %v1043_v49, %v792_v57  ;;  %v790_v60 = vadd.f32 %v781_v58, %v1279_v7 }
 0x286   : > { %v797_v61 = vadd.f32 %v1043_v49, %v790_v60 }
 0x287   : > { %804 = vst [vmem:[#allocation2 + $0x10] sm:$0xff] %v796_v55 }
 0x288   : > { %805 = vst [vmem:[#allocation2] sm:$0xff] %v797_v61 }
 0x289   : > { %806 = vst [vmem:[#allocation2 + $0x18] sm:$0xff] %v798_v53 }
 0x28a   : > { %807 = vst [vmem:[#allocation2 + $0x8] sm:$0xff] %v799_v59 }
 0x28b PF: > { %p966_p6 = scmp.ne.s32.totalorder %s1114_s30, 1 }
 0x28d   : > { %811 = sbr.rel (%p966_p6) target bundleno = 662 (0x296), region = 68 }
 0x292   : > { %812 = vst [vmem:[#allocation3] sm:$0xff] %v796_v55 }
 0x293   : > { %813 = vst [vmem:[#allocation3 + $0x8] sm:$0xff] %v797_v61 }
 0x294   : > { %814 = vst [vmem:[#allocation3 + $0x10] sm:$0xff] %v798_v53 }
 0x295   : > { %815 = vst [vmem:[#allocation3 + $0x18] sm:$0xff] %v799_v59 }
 0x296 PF: > { %p1009_p7 = scmp.eq.s32.totalorder %s893_s12, 1  ;;  %s826_s29 = sshll.u32 %s1372_s9, 4  ;;  %s827_s29 = int_to_ptr.hbm [resolvable:$true] %s826_s29 }
 0x297   : > { %s1124_s14 = smov [#allocation3]   ;;  %s1125_s16 = smov 128  }
 0x298   : > { %s824_s15 = sshll.u32 %s1124_s14, 4  ;;  %s1126_s17 = smov 8   ;;  %s825_s15 = int_to_ptr.vmem [resolvable:$true] %s824_s15 }
 0x299   : > { %1006 = dma.vmem_to_hbm [thread:$0]  (%p1009_p7), %s825_s15, 512, %s827_s29, [#allocation4], %s1125_s16, %s1125_s16, %s1126_s17  }
 0x29a   : > { %1109 = dma.done.wait (%p1009_p7), [#allocation4], 512  }
 0x29b   : > { %1111 = vsyncadd (%p1009_p7), [#allocation4], 4294966784 }
 0x29c PF: > { %s20_s11 = sadd.s32 1, %s1122_s11   ;;  %s1373_s30 = smov %s1118_s10 }
 0x29d   : > { %p17_p8 = scmp.ge.s32.totalorder %s20_s11, 4   ;;  %s1374_s10 = smov %s1376_s13 }
 0x29f   :  { %19 = sbr.rel (!%p17_p8) target bundleno = 2 (0x2), region = 104 }
 0x2a4   :  { %843 = vsyncpa [#allocation4], 1 }
 0x2a5   :  { %845 = vsyncpa [#allocation4 + $0x1], 1 }

</bundles_post_ra>
